<compile_context>
chip_gen: v7x
topology: tpu7x:2x2x1
jax: 0.10.0
libtpu: 0.0.40
codegen_flags: <defaults>
</compile_context>

<pallas_src>
import functools
import math

import jax
import jax.numpy as jnp
from jax.experimental import pallas as pl
from jax.experimental.pallas import tpu as pltpu

_LANES = 128


def _round_up(x, m):
    return ((x + m - 1) // m) * m


def _tversky_kernel(p_ref, g_ref, out_ref, tp_acc, sp_acc, sg_acc,
                    *, smooth, alpha, beta, gamma):
    k = pl.program_id(0)

    @pl.when(k == 0)
    def _():
        tp_acc[...] = jnp.zeros_like(tp_acc)
        sp_acc[...] = jnp.zeros_like(sp_acc)
        sg_acc[...] = jnp.zeros_like(sg_acc)

    p = p_ref[...]                     # (block_rows, 128) f32
    g = g_ref[...]                     # (block_rows, 128) f32
    br = p.shape[0]

    # Keep the steady-state loop on the VPU only: fold sublane groups with plain
    # vreg adds into (8, 128) accumulators; defer all cross-lane reductions to
    # the finalize step.
    p3 = p.reshape(br // 8, 8, _LANES)
    g3 = g.reshape(br // 8, 8, _LANES)
    tp_acc[...] += jnp.sum(p3 * g3, axis=0)
    sp_acc[...] += jnp.sum(p3, axis=0)
    sg_acc[...] += jnp.sum(g3, axis=0)

    @pl.when(k == pl.num_programs(0) - 1)
    def _():
        tp = jnp.sum(tp_acc[...])              # single XLU reduce at the end
        sp = jnp.sum(sp_acc[...])
        sg = jnp.sum(sg_acc[...])
        fp = sp - tp                           # sum((1-gt)*pred)
        fn = sg - tp                           # sum(gt*(1-pred))
        tversky = (tp + smooth) / (tp + alpha * fp + beta * fn + smooth)
        loss = 1.0 - tversky
        if gamma != 1.0:                       # static Python branch (compile-time)
            loss = jnp.power(loss, gamma)
        out_ref[...] = jnp.reshape(loss, (1, 1))


def tversky_loss(pred, gt, smooth=1.0, alpha=0.3, beta=0.7, gamma=1.0):
    """Equivalent of TverskyLoss().forward(pred, gt) -> scalar."""
    assert pred.shape == gt.shape
    total = int(math.prod(pred.shape))

    pflat = pred.reshape(-1).astype(jnp.float32)
    gflat = gt.reshape(-1).astype(jnp.float32)

    rows = pl.cdiv(total, _LANES)
    # Big lane-dense tiles: up to 2048 rows x 128 lanes (1 MiB per input per block),
    # shrunk for tiny inputs; always a multiple of 8 rows for full vreg packing.
    block_rows = min(2048, _round_up(rows, 8))
    padded_rows = _round_up(rows, block_rows)
    padded_total = padded_rows * _LANES

    pad = padded_total - total
    if pad:
        # Zero padding is exact for all three sums (TP, sum(pred), sum(gt)).
        pflat = jnp.pad(pflat, (0, pad))
        gflat = jnp.pad(gflat, (0, pad))

    p2 = pflat.reshape(padded_rows, _LANES)
    g2 = gflat.reshape(padded_rows, _LANES)
    grid = (padded_rows // block_rows,)

    kernel = functools.partial(
        _tversky_kernel,
        smooth=float(smooth), alpha=float(alpha),
        beta=float(beta), gamma=float(gamma),
    )

    out = pl.pallas_call(
        kernel,
        out_shape=jax.ShapeDtypeStruct((1, 1), jnp.float32),
        grid_spec=pltpu.PrefetchScalarGridSpec(
            num_scalar_prefetch=0,
            grid=grid,
            in_specs=[
                pl.BlockSpec((block_rows, _LANES), lambda k: (k, 0)),
                pl.BlockSpec((block_rows, _LANES), lambda k: (k, 0)),
            ],
            out_specs=pl.BlockSpec((1, 1), lambda k: (0, 0)),
            scratch_shapes=[
                pltpu.VMEM((8, _LANES), jnp.float32),   # sum(pred*gt) partials
                pltpu.VMEM((8, _LANES), jnp.float32),   # sum(pred)    partials
                pltpu.VMEM((8, _LANES), jnp.float32),   # sum(gt)      partials
            ],
        ),
        compiler_params=pltpu.CompilerParams(
            dimension_semantics=("arbitrary",),   # accumulation across the grid axis
        ),
        cost_estimate=pl.CostEstimate(
            flops=5 * total, transcendentals=0, bytes_accessed=8 * total),
    )(p2, g2)

    # TODO(synk): on v7x a second "parallel" grid axis could split the reduction
    # across the 2 TensorCores; omitted since the kernel is HBM-bound, not compute-bound.
    return out[0, 0]


def _reference(pred, gt, smooth=1.0, alpha=0.3, beta=0.7, gamma=1.0):
    """Pure-JAX reference matching the PyTorch module semantics."""
    p = pred.reshape(-1).astype(jnp.float32)
    g = gt.reshape(-1).astype(jnp.float32)
    tp = jnp.sum(p * g)
    fp = jnp.sum((1.0 - g) * p)
    fn = jnp.sum(g * (1.0 - p))
    tversky = (tp + smooth) / (tp + alpha * fp + beta * fn + smooth)
    return (1.0 - tversky) ** gamma


if __name__ == "__main__":
    key = jax.random.PRNGKey(0)
    k1, k2 = jax.random.split(key)

    # Small segmentation-style shapes: batch=2, channels=4, spatial=16x16.
    pred = jax.random.uniform(k1, (2, 4, 16, 16), dtype=jnp.float32)          # probabilities
    gt = (jax.random.uniform(k2, (2, 4, 16, 16)) > 0.5).astype(jnp.float32)   # binary ground truth

    loss = tversky_loss(pred, gt)
    loss = jax.block_until_ready(loss)

    ref = _reference(pred, gt)
    assert jnp.allclose(loss, ref, rtol=1e-5, atol=1e-5), (loss, ref)

    print("KERNEL_OK")
</pallas_src>

<mosaic_0001>
module attributes {stable_mosaic.version = 11 : i64} {
  func.func @_tversky_kernel(%arg0: i32, %arg1: memref<16x128xf32, #tpu.memory_space<vmem>>, %arg2: memref<16x128xf32, #tpu.memory_space<vmem>>, %arg3: memref<1x1xf32, #tpu.memory_space<vmem>>, %arg4: memref<8x128xf32, #tpu.memory_space<vmem>>, %arg5: memref<8x128xf32, #tpu.memory_space<vmem>>, %arg6: memref<8x128xf32, #tpu.memory_space<vmem>>) attributes {dimension_semantics = [#tpu.dimension_semantics<arbitrary>], iteration_bounds = array<i64: 1>, scalar_prefetch = 0 : i64, scratch_operands = 3 : i64, tpu.core_type = #tpu.core_type<tc>, window_params = [{transform_indices = @transform_0, window_bounds = array<i64: 16, 128>}, {transform_indices = @transform_1, window_bounds = array<i64: 16, 128>}, {pipeline_mode = #tpu.pipeline_mode<synchronous>, transform_indices = @transform_2, window_bounds = array<i64: 1, 1>}]} {
    %c0_i32 = arith.constant 0 : i32
    %0 = arith.cmpi eq, %arg0, %c0_i32 : i32
    %1 = arith.extui %0 : i1 to i32
    %c0_i32_0 = arith.constant 0 : i32
    %2 = arith.cmpi ne, %1, %c0_i32_0 : i32
    scf.if %2 {
      %cst_20 = arith.constant 0.000000e+00 : f32
      %23 = vector.broadcast %cst_20 : f32 to vector<8x128xf32>
      %c0_21 = arith.constant 0 : index
      %c0_22 = arith.constant 0 : index
      %24 = vector.load %arg4[%c0_21, %c0_22] : memref<8x128xf32, #tpu.memory_space<vmem>>, vector<8x128xf32>
      tpu.vector_store %arg4[%c0_21, %c0_22], %23 {strides = array<i32>} : memref<8x128xf32, #tpu.memory_space<vmem>>, vector<8x128xf32>,
      %cst_23 = arith.constant 0.000000e+00 : f32
      %25 = vector.broadcast %cst_23 : f32 to vector<8x128xf32>
      %c0_24 = arith.constant 0 : index
      %c0_25 = arith.constant 0 : index
      %26 = vector.load %arg5[%c0_24, %c0_25] : memref<8x128xf32, #tpu.memory_space<vmem>>, vector<8x128xf32>
      tpu.vector_store %arg5[%c0_24, %c0_25], %25 {strides = array<i32>} : memref<8x128xf32, #tpu.memory_space<vmem>>, vector<8x128xf32>,
      %cst_26 = arith.constant 0.000000e+00 : f32
      %27 = vector.broadcast %cst_26 : f32 to vector<8x128xf32>
      %c0_27 = arith.constant 0 : index
      %c0_28 = arith.constant 0 : index
      %28 = vector.load %arg6[%c0_27, %c0_28] : memref<8x128xf32, #tpu.memory_space<vmem>>, vector<8x128xf32>
      tpu.vector_store %arg6[%c0_27, %c0_28], %27 {strides = array<i32>} : memref<8x128xf32, #tpu.memory_space<vmem>>, vector<8x128xf32>,
    } else {
    }
    %c0 = arith.constant 0 : index
    %c0_1 = arith.constant 0 : index
    %3 = vector.load %arg1[%c0, %c0_1] : memref<16x128xf32, #tpu.memory_space<vmem>>, vector<16x128xf32>
    %c0_2 = arith.constant 0 : index
    %c0_3 = arith.constant 0 : index
    %4 = vector.load %arg2[%c0_2, %c0_3] : memref<16x128xf32, #tpu.memory_space<vmem>>, vector<16x128xf32>
    %5 = vector.shape_cast %3 : vector<16x128xf32> to vector<2x8x128xf32>
    %6 = vector.shape_cast %4 : vector<16x128xf32> to vector<2x8x128xf32>
    %c0_4 = arith.constant 0 : index
    %c0_5 = arith.constant 0 : index
    %7 = vector.load %arg4[%c0_4, %c0_5] : memref<8x128xf32, #tpu.memory_space<vmem>>, vector<8x128xf32>
    %8 = arith.mulf %5, %6 : vector<2x8x128xf32>
    %cst = arith.constant dense<0.000000e+00> : vector<8x128xf32>
    %9 = vector.multi_reduction <add>, %8, %cst [0] : vector<2x8x128xf32> to vector<8x128xf32>
    %10 = arith.addf %7, %9 : vector<8x128xf32>
    %c0_6 = arith.constant 0 : index
    %c0_7 = arith.constant 0 : index
    %11 = vector.load %arg4[%c0_6, %c0_7] : memref<8x128xf32, #tpu.memory_space<vmem>>, vector<8x128xf32>
    tpu.vector_store %arg4[%c0_6, %c0_7], %10 {strides = array<i32>} : memref<8x128xf32, #tpu.memory_space<vmem>>, vector<8x128xf32>,
    %c0_8 = arith.constant 0 : index
    %c0_9 = arith.constant 0 : index
    %12 = vector.load %arg5[%c0_8, %c0_9] : memref<8x128xf32, #tpu.memory_space<vmem>>, vector<8x128xf32>
    %cst_10 = arith.constant dense<0.000000e+00> : vector<8x128xf32>
    %13 = vector.multi_reduction <add>, %5, %cst_10 [0] : vector<2x8x128xf32> to vector<8x128xf32>
    %14 = arith.addf %12, %13 : vector<8x128xf32>
    %c0_11 = arith.constant 0 : index
    %c0_12 = arith.constant 0 : index
    %15 = vector.load %arg5[%c0_11, %c0_12] : memref<8x128xf32, #tpu.memory_space<vmem>>, vector<8x128xf32>
    tpu.vector_store %arg5[%c0_11, %c0_12], %14 {strides = array<i32>} : memref<8x128xf32, #tpu.memory_space<vmem>>, vector<8x128xf32>,
    %c0_13 = arith.constant 0 : index
    %c0_14 = arith.constant 0 : index
    %16 = vector.load %arg6[%c0_13, %c0_14] : memref<8x128xf32, #tpu.memory_space<vmem>>, vector<8x128xf32>
    %cst_15 = arith.constant dense<0.000000e+00> : vector<8x128xf32>
    %17 = vector.multi_reduction <add>, %6, %cst_15 [0] : vector<2x8x128xf32> to vector<8x128xf32>
    %18 = arith.addf %16, %17 : vector<8x128xf32>
    %c0_16 = arith.constant 0 : index
    %c0_17 = arith.constant 0 : index
    %19 = vector.load %arg6[%c0_16, %c0_17] : memref<8x128xf32, #tpu.memory_space<vmem>>, vector<8x128xf32>
    tpu.vector_store %arg6[%c0_16, %c0_17], %18 {strides = array<i32>} : memref<8x128xf32, #tpu.memory_space<vmem>>, vector<8x128xf32>,
    %c0_i32_18 = arith.constant 0 : i32
    %20 = arith.cmpi eq, %arg0, %c0_i32_18 : i32
    %21 = arith.extui %20 : i1 to i32
    %c0_i32_19 = arith.constant 0 : i32
    %22 = arith.cmpi ne, %21, %c0_i32_19 : i32
    scf.if %22 {
      %c0_20 = arith.constant 0 : index
      %c0_21 = arith.constant 0 : index
      %23 = vector.load %arg4[%c0_20, %c0_21] : memref<8x128xf32, #tpu.memory_space<vmem>>, vector<8x128xf32>
      %24 = vector.shape_cast %23 : vector<8x128xf32> to vector<1x8x128xf32>
      %cst_22 = arith.constant dense<0.000000e+00> : vector<1xf32>
      %25 = vector.multi_reduction <add>, %24, %cst_22 [1, 2] : vector<1x8x128xf32> to vector<1xf32>
      %26 = vector.shape_cast %25 : vector<1xf32> to vector<1x1x1xf32>
      %27 = vector.extract %26[0, 0, 0] : f32 from vector<1x1x1xf32>
      %c0_23 = arith.constant 0 : index
      %c0_24 = arith.constant 0 : index
      %28 = vector.load %arg5[%c0_23, %c0_24] : memref<8x128xf32, #tpu.memory_space<vmem>>, vector<8x128xf32>
      %29 = vector.shape_cast %28 : vector<8x128xf32> to vector<1x8x128xf32>
      %cst_25 = arith.constant dense<0.000000e+00> : vector<1xf32>
      %30 = vector.multi_reduction <add>, %29, %cst_25 [1, 2] : vector<1x8x128xf32> to vector<1xf32>
      %31 = vector.shape_cast %30 : vector<1xf32> to vector<1x1x1xf32>
      %32 = vector.extract %31[0, 0, 0] : f32 from vector<1x1x1xf32>
      %c0_26 = arith.constant 0 : index
      %c0_27 = arith.constant 0 : index
      %33 = vector.load %arg6[%c0_26, %c0_27] : memref<8x128xf32, #tpu.memory_space<vmem>>, vector<8x128xf32>
      %34 = vector.shape_cast %33 : vector<8x128xf32> to vector<1x8x128xf32>
      %cst_28 = arith.constant dense<0.000000e+00> : vector<1xf32>
      %35 = vector.multi_reduction <add>, %34, %cst_28 [1, 2] : vector<1x8x128xf32> to vector<1xf32>
      %36 = vector.shape_cast %35 : vector<1xf32> to vector<1x1x1xf32>
      %37 = vector.extract %36[0, 0, 0] : f32 from vector<1x1x1xf32>
      %38 = arith.subf %32, %27 : f32
      %39 = arith.subf %37, %27 : f32
      %cst_29 = arith.constant 1.000000e+00 : f32
      %40 = arith.addf %27, %cst_29 : f32
      %cst_30 = arith.constant 3.000000e-01 : f32
      %41 = arith.mulf %cst_30, %38 : f32
      %42 = arith.addf %27, %41 : f32
      %cst_31 = arith.constant 0.699999988 : f32
      %43 = arith.mulf %cst_31, %39 : f32
      %44 = arith.addf %42, %43 : f32
      %cst_32 = arith.constant 1.000000e+00 : f32
      %45 = arith.addf %44, %cst_32 : f32
      %46 = arith.divf %40, %45 : f32
      %cst_33 = arith.constant 1.000000e+00 : f32
      %47 = arith.subf %cst_33, %46 : f32
      %48 = vector.broadcast %47 : f32 to vector<1x1xf32>
      %c0_34 = arith.constant 0 : index
      %c0_35 = arith.constant 0 : index
      %49 = vector.load %arg3[%c0_34, %c0_35] : memref<1x1xf32, #tpu.memory_space<vmem>>, vector<1x1xf32>
      tpu.vector_store %arg3[%c0_34, %c0_35], %48 {strides = array<i32>} : memref<1x1xf32, #tpu.memory_space<vmem>>, vector<1x1xf32>,
    } else {
    }
    return
  }
  func.func @transform_0(%arg0: i32) -> (i32, i32) {
    %c0_i32 = arith.constant 0 : i32
    %c0_i32_0 = arith.constant 0 : i32
    return %arg0, %c0_i32 : i32, i32
  }
  func.func @transform_1(%arg0: i32) -> (i32, i32) {
    %c0_i32 = arith.constant 0 : i32
    %c0_i32_0 = arith.constant 0 : i32
    return %arg0, %c0_i32 : i32, i32
  }
  func.func @transform_2(%arg0: i32) -> (i32, i32) {
    %c0_i32 = arith.constant 0 : i32
    %c0_i32_0 = arith.constant 0 : i32
    %c0_i32_1 = arith.constant 0 : i32
    return %c0_i32, %c0_i32_0 : i32, i32
  }
}

</mosaic_0001>

<bundles_post_ra>
// kernel: tpu_custom_call.1
= control target key start
LH: loop header
LB: loop body
LE: loop exit
PB: predicated region body
PF: predicated region fallthrough
CT: control target
= control target key end

     0   :  { %7 = vsyncpa [#allocation6], 0  ;;  %s273_s0 = inlined_call_operand.hbm [shape: f32[16,128], index: 0, kind: input, shape index: {}]   ;;  %s274_s1 = inlined_call_operand.hbm [shape: f32[16,128], index: 1, kind: input, shape index: {}]   ;;  %s275_s2 = inlined_call_operand.hbm [shape: f32[1,1], index: 2, kind: output, shape index: {}]  }
   0x1   :  { %8 = vsyncpa [#allocation9], 0 }
   0x2   :  { %9 = vsyncpa [#allocation7], 0  ;;  %s217_s9 = smov [#allocation5]   ;;  %s145_s13 = scalar_lea.hbm %s273_s0, 256 }
   0x3   :  { %s15_s10 = sshll.u32 %s217_s9, 4  ;;  %p146_p0 = scmp.ne.s32.totalorder %s273_s0, %s145_s13  ;;  %s16_s10 = int_to_ptr.vmem [resolvable:$true] %s15_s10 }
   0x4   :  { %p149_p1 = scmp.lt.u32.totalorder %s145_s13, %s273_s0 }
   0x6   :  { %p151_p2 = pnand %p149_p1, %p146_p0 }
   0x8   :  { %154 = shalt.err (!%p151_p2)
}
   0x9   :  { %s155_s18 = scalar_lea.vmem %s16_s10, 256  ;;  %p160_p4 = scmp.lt.s32.totalorder %s16_s10, %s16_s10 }
   0xa   :  { %p156_p3 = scmp.ne.s32.totalorder %s16_s10, %s155_s18  ;;  %p161_p5 = scmp.lt.s32.totalorder %s155_s18, %s155_s18 }
   0xc   :  { %p162_p6 = por %p161_p5, %p160_p4 }
   0xe   :  { %p163_p7 = pnand %p162_p6, %p156_p3 }
  0x10   :  { %166 = shalt.err (!%p163_p7)
}
  0x11   :  { %s218_s19 = smov 128   ;;  %s219_s20 = smov 8  }
  0x12   :  { %21 = dma.hbm_to_vmem [thread:$0]  %s273_s0, 256, %s16_s10, [#allocation6], %s218_s19, %s218_s19, %s219_s20  }
  0x13   :  { %s220_s23 = smov [#allocation8]   ;;  %s167_s27 = scalar_lea.hbm %s274_s1, 256 }
  0x14   :  { %s27_s24 = sshll.u32 %s220_s23, 4  ;;  %p168_p8 = scmp.ne.s32.totalorder %s274_s1, %s167_s27  ;;  %s28_s24 = int_to_ptr.vmem [resolvable:$true] %s27_s24 }
  0x15   :  { %p171_p9 = scmp.lt.u32.totalorder %s167_s27, %s274_s1 }
  0x17   :  { %p173_p10 = pnand %p171_p9, %p168_p8 }
  0x19   :  { %176 = shalt.err (!%p173_p10)
}
  0x1a   :  { %s177_s4 = scalar_lea.vmem %s28_s24, 256  ;;  %p182_p12 = scmp.lt.s32.totalorder %s28_s24, %s28_s24 }
  0x1b   :  { %p178_p11 = scmp.ne.s32.totalorder %s28_s24, %s177_s4  ;;  %p183_p13 = scmp.lt.s32.totalorder %s177_s4, %s177_s4 }
  0x1d   :  { %p184_p0 = por %p183_p13, %p182_p12 }
  0x1f   :  { %p185_p1 = pnand %p184_p0, %p178_p11 }
  0x21   :  { %188 = shalt.err (!%p185_p1)
}
  0x22   :  { %33 = dma.hbm_to_vmem [thread:$0]  %s274_s1, 256, %s28_s24, [#allocation9], %s218_s19, %s218_s19, %s219_s20  }
  0x23   :  { %211 = dma.done.wait [#allocation6], 256  }
  0x24   :  { %212 = vsyncadd [#allocation6], 4294967040 }
  0x25   :  { %213 = dma.done.wait [#allocation9], 256  }
  0x26   :  { %214 = vsyncadd [#allocation9], 4294967040  ;;  %v49_v0 = vld [vmem:[#allocation8] sm:$0xff]  ;;  %v50_v1 = vld [vmem:[#allocation8 + $0x8] sm:$0xff]  ;;  %s221_s18 = smov [#allocation10]   ;;  %vm112_vm0 = vcmask 0  }
  0x27   :  { %v47_v2 = vld [vmem:[#allocation5] sm:$0xff]  ;;  %v62_v3 = vadd.f32 %v50_v1, %v49_v0  ;;  %v48_v4 = vld [vmem:[#allocation5 + $0x8] sm:$0xff]  ;;  %s120_s19 = sshll.u32 %s221_s18, 4  ;;  %s121_s19 = int_to_ptr.vmem [resolvable:$true] %s120_s19 }
  0x28   :  { %v52_v5 = vmul.f32 %v49_v0, %v47_v2  ;;  %v53_v6 = vmul.f32 %v50_v1, %v48_v4  ;;  %v58_v8 = vadd.f32 %v48_v4, %v47_v2  ;;  %s189_s21 = scalar_lea.vmem %s121_s19, 16  ;;  %s193_s22 = scalar_lea.vmem %s121_s19, 32 }
  0x29   :  { %89 = vadd.xlane.f32.xlu1 %v62_v3  ;;  %p190_p2 = scmp.ne.s32.totalorder %s121_s19, %s189_s21  ;;  %p194_p3 = scmp.lt.s32.totalorder %s121_s19, %s121_s19 }
  0x2a   :  { %v54_v7 = vadd.f32 %v53_v6, %v52_v5  ;;  %p195_p4 = scmp.lt.s32.totalorder %s193_s22, %s189_s21 }
  0x2c   :  { %69 = vadd.xlane.f32.xlu0 %v54_v7  ;;  %p196_p5 = por %p195_p4, %p194_p3 }
  0x2e   :  { %p197_p6 = pnand %p196_p5, %p190_p2 }
  0x30   :  { %79 = vadd.xlane.f32.xlu0 %v58_v8 }
  0xb6   :  { %v90_v9 = vpop.xlane.xlu1 %89 }
  0xb7   :  { %v91_v10 = vrot.slane %v90_v9, 4 }
  0xb9   :  { %v92_v11 = vadd.f32 %v91_v10, %v90_v9  ;;  %v70_v12 = vpop.xlane.xlu0 %69 }
  0xba   :  { %v71_v13 = vrot.slane %v70_v12, 4 }
  0xbb   :  { %v93_v15 = vrot.slane %v92_v11, 2 }
  0xbc   :  { %v72_v14 = vadd.f32 %v71_v13, %v70_v12 }
  0xbd   :  { %v80_v16 = vpop.xlane.xlu0 %79  ;;  %v94_v21 = vadd.f32 %v93_v15, %v92_v11 }
  0xbe   :  { %v73_v17 = vrot.slane %v72_v14, 2  ;;  %v81_v18 = vrot.slane %v80_v16, 4 }
  0xbf   :  { %v95_v26 = vrot.slane %v94_v21, 1 }
  0xc0   :  { %v82_v19 = vadd.f32 %v81_v18, %v80_v16  ;;  %v74_v20 = vadd.f32 %v73_v17, %v72_v14 }
  0xc1   :  { %v96_v29 = vadd.f32 %v95_v26, %v94_v21 }
  0xc2   :  { %v83_v22 = vrot.slane %v82_v19, 2  ;;  %v75_v23 = vrot.slane %v74_v20, 1 }
  0xc4   :  { %v84_v24 = vadd.f32 %v83_v22, %v82_v19  ;;  %v76_v25 = vadd.f32 %v75_v23, %v74_v20 }
  0xc6   :  { %130 = vpush %v76_v25  ;;  %v85_v27 = vrot.slane %v84_v24, 1 }
  0xc8   :  { %v86_v28 = vadd.f32 %v85_v27, %v84_v24 }
  0xca   :  { %132 = vpush %v86_v28 }
  0xcb   :  { %134 = vpush %v96_v29 }
  0xf7   :  { %s131_s1 = spop %130 }
  0xf8   :  { %s100_s15 = sadd.f32 1.0, %s131_s1 }
  0xfb   :  { %s133_s6 = spop %132 }
  0xfc   :  { %s98_s7 = ssub.f32 %s133_s6, %s131_s1  ;;  %s135_s8 = spop %134 }
  0xfd   :  { %s99_s9 = ssub.f32 %s135_s8, %s131_s1 }
  0xfe   :  { %s101_s10 = smul.f32 0.3, %s98_s7 }
  0xff   :  { %s103_s12 = smul.f32 0.7, %s99_s9 }
 0x100   :  { %s102_s11 = sadd.f32 %s131_s1, %s101_s10 }
 0x102   :  { %s104_s13 = sadd.f32 %s103_s12, %s102_s11 }
 0x104   :  { %s105_s14 = sadd.f32 1.0, %s104_s13 }
 0x106   :  { %v106_v30 = vstv %s105_s14 }
 0x107   :  { %143 = vrcp.f32 %v106_v30 }
 0x111   :  { %v144_v31 = vpop.eup %143 }
 0x112   :  { %136 = vpush %v144_v31 }
 0x143   :  { %s137_s16 = spop %136 }
 0x144   :  { %s109_s17 = smul.f32 %s137_s16, %s100_s15 }
 0x146   :  { %s110_s20 = ssub.f32 1.0, %s109_s17 }
 0x148   :  { %v111_v32 = vstv %s110_s20 }
 0x149   :  { %113 = vst.msk [vmem:[#allocation10] sm:$0x1] %vm112_vm0, %v111_v32 }
 0x14a   :  { %200 = shalt.err (!%p197_p6)
}
 0x14b   :  { %s201_s25 = scalar_lea.hbm %s275_s2, 16 }
 0x14c   :  { %p202_p7 = scmp.ne.s32.totalorder %s275_s2, %s201_s25  ;;  %p205_p8 = scmp.lt.u32.totalorder %s201_s25, %s275_s2 }
 0x14e   :  { %p207_p9 = pnand %p205_p8, %p202_p7 }
 0x150   :  { %210 = shalt.err (!%p207_p9)
}
 0x151   :  { %123 = dma.vmem_to_hbm [thread:$0]  %s121_s19, 16, %s275_s2, [#allocation7]  }
 0x152   :  { %215 = dma.done.wait [#allocation7], 16  }
 0x153   :  { %216 = vsyncadd [#allocation7], 4294967280 }
 0x154   :  { %127 = vsyncpa [#allocation6], 1 }
 0x155   :  { %128 = vsyncpa [#allocation9], 1 }
 0x156   :  { %129 = vsyncpa [#allocation7], 1 }

</bundles_post_ra>
